<compile_context>
chip_gen: v5e
topology: v5e:2x2
jax: 0.10.0
libtpu: 0.0.40
codegen_flags: <defaults>
</compile_context>

<pallas_src>
import functools

import numpy as np
import jax
import jax.numpy as jnp
from jax.experimental import pallas as pl
from jax.experimental.pallas import tpu as pltpu


def _round_up(x, m):
    return (x + m - 1) // m * m


@functools.lru_cache(maxsize=None)
def _tpu_tuning():
    """(matmul tile cap, vmem_limit_bytes, tensorcores-per-chip) per generation."""
    kind = ""
    try:
        kind = jax.devices()[0].device_kind.lower()
    except Exception:  # pragma: no cover
        pass
    if "v7" in kind:      # 64 MiB VMEM, 2 TC/chip: big tiles, tighter budget
        return 1024, 48 * 1024 * 1024, 2
    if "v6" in kind:      # 128 MiB VMEM: go big
        return 1024, 64 * 1024 * 1024, 1
    return 512, 32 * 1024 * 1024, 1      # v5e / default: 512 tiles already balanced


def _pick_block(dim, cap, align=8):
    """Largest block <= cap that divides `dim` (multiple of `align`): avoids the
    pad-whole-array + slice-output round trips of the previous version."""
    if dim <= cap:
        return dim
    b = (cap // align) * align
    while b >= align:
        if dim % b == 0:
            return b
        b -= align
    return cap           # no aligned divisor -> caller pads (rare fallback)


def _pick_bk(K):
    """K tile: divisor of K, multiple of 128, <= 1024 (>=2 K steps for K>1024 so
    the next K slab's DMA overlaps the current matmul)."""
    if K <= 1024:
        return K
    b = 1024
    while b >= 128:
        if K % b == 0:
            return b
        b -= 128
    return K


# ---------------------------------------------------------------------------
# Pallas kernels
# ---------------------------------------------------------------------------
def _matmul_bn_kernel(relu, has_residual):
    """K-tiled matmul (bf16 in, f32 accum).  BN scale is pre-folded into the
    weights, so the epilogue is acc + shift (+ residual) (+ ReLU), bf16 out."""

    def kernel(*refs):
        if has_residual:
            p_ref, w_ref, b_ref, r_ref, o_ref, acc_ref = refs
        else:
            p_ref, w_ref, b_ref, o_ref, acc_ref = refs
            r_ref = None
        k = pl.program_id(2)

        @pl.when(k == 0)
        def _():
            acc_ref[...] = jnp.zeros_like(acc_ref)

        acc_ref[...] += jnp.dot(p_ref[...], w_ref[...],
                                preferred_element_type=jnp.float32)

        @pl.when(k == pl.num_programs(2) - 1)
        def _():
            y = acc_ref[...] + b_ref[...]
            if has_residual:
                y = y + r_ref[...].astype(jnp.float32)
            if relu:
                y = jnp.maximum(y, 0.0)
            o_ref[...] = y.astype(o_ref.dtype)

    return kernel


def _direct3x3_kernel(Wp, P, Cin, relu):
    """3x3 stride-1 pad-1 conv on a zero-padded, width-flattened image: the 9
    kernel taps are 9 row-offset slices of the flat (Hp*Wp, Cin) activation,
    reduced in-kernel into an f32 VMEM accumulator -- no im2col in HBM."""

    def kernel(x_ref, w_ref, b_ref, o_ref, acc_ref):
        acc_ref[...] = jnp.zeros_like(acc_ref)
        xv = x_ref[0]                                    # (L, Cin) in VMEM
        for kh in range(3):
            for kw in range(3):
                t = kh * 3 + kw
                off = kh * Wp + kw
                xs = xv[off:off + P, :]                  # shifted window (static slice)
                wt = w_ref[t * Cin:(t + 1) * Cin, :]     # per-tap weight slab
                acc_ref[...] += jnp.dot(xs, wt,
                                        preferred_element_type=jnp.float32)
        y = acc_ref[...] + b_ref[...]
        if relu:
            y = jnp.maximum(y, 0.0)
        o_ref[0] = y.astype(o_ref.dtype)

    return kernel


def _maxpool_kernel(C):
    """3x3 stride-2 pad-1 max pool on one image.  Input arrives as
    (Hp, OW+1, 2C): even/odd padded columns sit in the two C-wide lane halves
    (from a free XLA reshape), so no strided HBM splits are needed.  Pad value
    is 0, valid because the input is post-ReLU (>= 0)."""

    def kernel(x_ref, o_ref):
        v = x_ref[0]                       # (Hp, OW+1, 2C)
        e = v[:, :, :C]                    # even padded columns
        o = v[:, :, C:]                    # odd  padded columns
        hp = v.shape[0]
        oh, ow = o_ref.shape[1], o_ref.shape[2]
        # kw taps of output col j: padded cols 2j, 2j+1, 2j+2
        mw = jnp.maximum(jnp.maximum(e[:, :ow, :], o[:, :ow, :]),
                         e[:, 1:ow + 1, :])
        # kh taps: stride-1 row shifts
        mh = jnp.maximum(jnp.maximum(mw[0:hp - 2], mw[1:hp - 1]), mw[2:hp])
        # stride-2 row subsample via a leading-dim regroup (no strided slice)
        o_ref[0] = mh.reshape(oh, 2, ow, C)[:, 0].astype(o_ref.dtype)

    return kernel


# ---------------------------------------------------------------------------
# Pallas wrappers
# ---------------------------------------------------------------------------
def fused_matmul(patches, w, shift, relu, residual=None):
    """out = [relu]((patches @ w) + shift [+ residual]) in bf16 (scale folded)."""
    M, K = patches.shape
    N = w.shape[1]
    cap, vmem_bytes, n_tc = _tpu_tuning()
    bm = _pick_block(M, cap)
    bn = _pick_block(N, cap)
    bk = _pick_bk(K)
    # v7x: 2 TensorCores shard the parallel grid axes; keep >= 2 parallel blocks.
    if n_tc > 1 and (M // bm) == 1 and (N // bn) == 1 and bn >= 256:
        bn //= 2

    Mp = M
    if M % bm != 0:          # rare fallback: M has no 8-aligned divisor <= cap
        Mp = _round_up(M, bm)
        patches = jnp.pad(patches, ((0, Mp - M), (0, 0)))
        if residual is not None:
            residual = jnp.pad(residual, ((0, Mp - M), (0, 0)))

    in_specs = [
        pl.BlockSpec((bm, bk), lambda i, j, k: (i, k)),
        pl.BlockSpec((bk, bn), lambda i, j, k: (k, j)),
        pl.BlockSpec((1, bn), lambda i, j, k: (0, j)),
    ]
    args = [patches, w, shift]
    if residual is not None:
        in_specs.append(pl.BlockSpec((bm, bn), lambda i, j, k: (i, j)))
        args.append(residual)

    out = pl.pallas_call(
        _matmul_bn_kernel(relu, residual is not None),
        out_shape=jax.ShapeDtypeStruct((Mp, N), jnp.bfloat16),
        grid=(Mp // bm, N // bn, K // bk),
        in_specs=in_specs,
        out_specs=pl.BlockSpec((bm, bn), lambda i, j, k: (i, j)),
        scratch_shapes=[pltpu.VMEM((bm, bn), jnp.float32)],
        compiler_params=pltpu.CompilerParams(
            dimension_semantics=("parallel", "parallel", "arbitrary"),
            vmem_limit_bytes=vmem_bytes,
        ),
    )(*args)
    if Mp != M:
        out = out[:M]
    return out


@functools.partial(jax.jit, static_argnames=("relu",))
def conv3x3_s1_bn(x, w, shift, relu=True):
    """3x3 stride-1 pad-1 conv + BN (+ReLU), taps reduced in-kernel (no im2col)."""
    B, H, W, Cin = x.shape
    N = w.shape[1]
    Wp = W + 2
    # zero pad: 1 top / 2 bottom / 1 left / 1 right.  The extra bottom row keeps
    # the shifted flat reads of the 2 garbage right-edge columns in-bounds.
    xp = jnp.pad(x, ((0, 0), (1, 2), (1, 1), (0, 0)))
    L = (H + 3) * Wp
    xf = xp.reshape(B, L, Cin)                 # free reshape (contiguous)
    P = H * Wp                                 # rows computed per image
    cap, vmem_bytes, _ = _tpu_tuning()
    bn = _pick_block(N, cap)                   # N <= 512 -> bn = N
    out = pl.pallas_call(
        _direct3x3_kernel(Wp, P, Cin, relu),
        out_shape=jax.ShapeDtypeStruct((B, P, N), jnp.bfloat16),
        grid=(B, N // bn),
        in_specs=[
            pl.BlockSpec((1, L, Cin), lambda b, j: (b, 0, 0)),
            pl.BlockSpec((9 * Cin, bn), lambda b, j: (0, j)),
            pl.BlockSpec((1, bn), lambda b, j: (0, j)),
        ],
        out_specs=pl.BlockSpec((1, P, bn), lambda b, j: (b, 0, j)),
        scratch_shapes=[pltpu.VMEM((P, bn), jnp.float32)],
        compiler_params=pltpu.CompilerParams(
            dimension_semantics=("parallel", "parallel"),
            vmem_limit_bytes=vmem_bytes,
        ),
    )(xf, w, shift)
    # drop the 2 garbage columns appended to every output row
    return out.reshape(B, H, Wp, N)[:, :, :W, :]


@jax.jit
def maxpool_3x3_s2_p1(x):
    """x: (B, H, W, C) NHWC with even H, W -> (B, H//2, W//2, C)."""
    B, H, W, C = x.shape
    assert H % 2 == 0 and W % 2 == 0, "maxpool kernel assumes even spatial dims"
    OH, OW = H // 2, W // 2
    _, vmem_bytes, _ = _tpu_tuning()
    xp = jnp.pad(x, ((0, 0), (1, 1), (1, 1), (0, 0)))   # zero pad (x >= 0 post-ReLU)
    Hp = H + 2
    xr = xp.reshape(B, Hp, OW + 1, 2 * C)                # free even/odd column split
    return pl.pallas_call(
        _maxpool_kernel(C),
        out_shape=jax.ShapeDtypeStruct((B, OH, OW, C), x.dtype),
        grid=(B,),
        in_specs=[pl.BlockSpec((1, Hp, OW + 1, 2 * C), lambda b: (b, 0, 0, 0))],
        out_specs=pl.BlockSpec((1, OH, OW, C), lambda b: (b, 0, 0, 0)),
        compiler_params=pltpu.CompilerParams(
            dimension_semantics=("parallel",),
            vmem_limit_bytes=vmem_bytes),
    )(xr)


# ---------------------------------------------------------------------------
# JAX glue: im2col (stem / stride-2 only) and conv wrappers
# ---------------------------------------------------------------------------
def _im2col(x, KH, KW, stride, padding):
    B, H, W, C = x.shape
    if padding:
        x = jnp.pad(x, ((0, 0), (padding, padding), (padding, padding), (0, 0)))
    Hp, Wp = H + 2 * padding, W + 2 * padding
    OH = (Hp - KH) // stride + 1
    OW = (Wp - KW) // stride + 1
    if KH == 1 and KW == 1:
        patches = x[:, ::stride, ::stride, :]
    else:
        cols = []
        for kh in range(KH):
            for kw in range(KW):
                cols.append(x[:, kh:kh + (OH - 1) * stride + 1:stride,
                              kw:kw + (OW - 1) * stride + 1:stride, :])
        patches = jnp.concatenate(cols, axis=-1)
    return patches.reshape(B * OH * OW, KH * KW * C), OH, OW


@functools.partial(jax.jit,
                   static_argnames=("KH", "KW", "stride", "padding", "relu", "k_total"))
def conv_im2col_bn(x, w, shift, KH, KW, stride, padding, relu, k_total=None):
    """Conv + BN (+ReLU) via materialized im2col -- only the 7x7 stem and the
    three stride-2 3x3 convs use this path."""
    # TODO(synk): reduce stride-2 3x3 / 7x7 taps in-kernel too (phase split of
    # the padded activation) to remove the remaining im2col materialization.
    B = x.shape[0]
    patches, OH, OW = _im2col(x, KH, KW, stride, padding)
    if k_total is not None and patches.shape[1] < k_total:
        patches = jnp.pad(patches, ((0, 0), (0, k_total - patches.shape[1])))
    out = fused_matmul(patches, w, shift, relu=relu)
    return out.reshape(B, OH, OW, -1)


@functools.partial(jax.jit, static_argnames=("stride", "relu"))
def conv1x1_bn(x, w, shift, stride=1, relu=True, residual=None):
    """1x1 conv + BN (+residual) (+ReLU): a pure fused matmul (no im2col copy)."""
    if stride > 1:
        x = x[:, ::stride, ::stride, :]
    B, H, W, Cin = x.shape
    N = w.shape[1]
    patches = x.reshape(B * H * W, Cin)
    res = None
    if residual is not None:
        res = residual.reshape(B * H * W, N)
    out = fused_matmul(patches, w, shift, relu=relu, residual=res)
    return out.reshape(B, H, W, N)


# ---------------------------------------------------------------------------
# Deterministic ResNet-50 parameter initialization (exact torchvision shapes)
# ---------------------------------------------------------------------------
class _ParamGen:
    def __init__(self, key):
        self._key = key

    def next(self):
        self._key, k = jax.random.split(self._key)
        return k


def _make_conv_bn(pg, KH, KW, Cin, Cout, eps=1e-5):
    """Conv weights + eval-mode BatchNorm folded to (scale, shift); the scale is
    folded directly into the bf16 MXU weights (epilogue = acc + shift)."""
    fan_in = KH * KW * Cin
    w = jax.random.normal(pg.next(), (KH, KW, Cin, Cout), jnp.float32)
    w = w * np.sqrt(2.0 / fan_in)
    gamma = jax.random.uniform(pg.next(), (Cout,), minval=0.5, maxval=1.5)
    beta = jax.random.normal(pg.next(), (Cout,), jnp.float32) * 0.1
    running_mean = jax.random.normal(pg.next(), (Cout,), jnp.float32) * 0.1
    running_var = jax.random.uniform(pg.next(), (Cout,), minval=0.5, maxval=1.5)
    scale = gamma / jnp.sqrt(running_var + eps)
    shift = beta - running_mean * scale
    w_folded = (w * scale).reshape(KH * KW * Cin, Cout)
    return {"w": w_folded.astype(jnp.bfloat16),
            "shift": shift.reshape(1, Cout).astype(jnp.float32)}


def _pad_axis(p, axis, new_size):
    """Zero-pad a conv's weight (and shift, for output-channel pads)."""
    w = p["w"]
    pads = [(0, 0), (0, 0)]
    pads[axis] = (0, new_size - w.shape[axis])
    out = dict(p)
    out["w"] = jnp.pad(w, pads)
    if axis == 1:
        out["shift"] = jnp.pad(p["shift"],
                               ((0, 0), (0, new_size - p["shift"].shape[1])))
    return out


def init_resnet50_params(key):
    pg = _ParamGen(key)
    stem = _make_conv_bn(pg, 7, 7, 3, 64)
    # Lane/sublane alignment: pad K 147->256 and Cout 64->128 with zeros (the
    # extra output channels stay exactly 0 through BN + ReLU + maxpool).
    stem = _pad_axis(_pad_axis(stem, 0, 256), 1, 128)
    params = {"conv1": stem}

    stage_cfg = [(64, 3, 1), (128, 4, 2), (256, 6, 2), (512, 3, 2)]
    inplanes = 64
    layers = []
    first_stage = True
    for planes, nblocks, stride in stage_cfg:
        blocks = []
        for bi in range(nblocks):
            s = stride if bi == 0 else 1
            block = {
                "stride": s,
                "conv1": _make_conv_bn(pg, 1, 1, inplanes, planes),
                "conv2": _make_conv_bn(pg, 3, 3, planes, planes),
                "conv3": _make_conv_bn(pg, 1, 1, planes, planes * 4),
            }
            if s != 1 or inplanes != planes * 4:
                block["downsample"] = _make_conv_bn(pg, 1, 1, inplanes, planes * 4)
            if first_stage and bi == 0:
                # consume the channel-padded (128-wide) stem output
                block["conv1"] = _pad_axis(block["conv1"], 0, 128)
                block["downsample"] = _pad_axis(block["downsample"], 0, 128)
            blocks.append(block)
            inplanes = planes * 4
        layers.append(blocks)
        first_stage = False
    params["layers"] = layers
    return params


# ---------------------------------------------------------------------------
# Forward pass (EncoderCNN.forward semantics)
# ---------------------------------------------------------------------------
def _bottleneck(x, bp):
    s = bp["stride"]
    out = conv1x1_bn(x, bp["conv1"]["w"], bp["conv1"]["shift"], stride=1, relu=True)
    if s == 1:
        out = conv3x3_s1_bn(out, bp["conv2"]["w"], bp["conv2"]["shift"], relu=True)
    else:
        out = conv_im2col_bn(out, bp["conv2"]["w"], bp["conv2"]["shift"],
                             KH=3, KW=3, stride=s, padding=1, relu=True)
    if "downsample" in bp:
        identity = conv1x1_bn(x, bp["downsample"]["w"], bp["downsample"]["shift"],
                              stride=s, relu=False)
    else:
        identity = x
    # conv3: residual add + ReLU fused into the matmul epilogue
    return conv1x1_bn(out, bp["conv3"]["w"], bp["conv3"]["shift"],
                      stride=1, relu=True, residual=identity)


def encoder_cnn_forward(params, images):
    """images: (B, 3, H, W) NCHW float32 (PyTorch convention).
    Returns (B, H/32 * W/32, 2048), matching
    resnet_backbone(images).permute(0, 2, 3, 1).view(B, -1, 2048)."""
    x = jnp.transpose(images, (0, 2, 3, 1)).astype(jnp.bfloat16)   # NCHW -> NHWC
    p = params["conv1"]
    x = conv_im2col_bn(x, p["w"], p["shift"], KH=7, KW=7, stride=2, padding=3,
                       relu=True, k_total=256)
    x = maxpool_3x3_s2_p1(x)
    for blocks in params["layers"]:
        for bp in blocks:
            x = _bottleneck(x, bp)
    B, H, W, C = x.shape
    # PyTorch: permute(0,2,3,1).view(B, -1, C)  (we are already NHWC)
    return x.reshape(B, H * W, C).astype(jnp.float32)


# ---------------------------------------------------------------------------
if __name__ == "__main__":
    key = jax.random.PRNGKey(0)
    pkey, xkey = jax.random.split(key)

    params = init_resnet50_params(pkey)
    # Small but valid shape for a /32 backbone: 64x64 -> 2x2 feature map.
    images = jax.random.normal(xkey, (2, 3, 64, 64), dtype=jnp.float32)

    feats = encoder_cnn_forward(params, images)
    feats = jax.block_until_ready(feats)

    assert feats.shape == (2, 4, 2048), feats.shape
    assert bool(jnp.all(jnp.isfinite(feats)))
    print("KERNEL_OK")
</pallas_src>

<mosaic_0001>
module attributes {stable_mosaic.version = 11 : i64} {
  func.func @kernel(%arg0: i32, %arg1: i32, %arg2: i32, %arg3: memref<512x256xbf16, #tpu.memory_space<vmem>>, %arg4: memref<256x128xbf16, #tpu.memory_space<vmem>>, %arg5: memref<1x128xf32, #tpu.memory_space<vmem>>, %arg6: memref<512x128xbf16, #tpu.memory_space<vmem>>, %arg7: memref<512x128xf32, #tpu.memory_space<vmem>>) attributes {dimension_semantics = [#tpu.dimension_semantics<parallel>, #tpu.dimension_semantics<parallel>, #tpu.dimension_semantics<arbitrary>], iteration_bounds = array<i64: 4, 1, 1>, scalar_prefetch = 0 : i64, scratch_operands = 1 : i64, tpu.core_type = #tpu.core_type<tc>, window_params = [{transform_indices = @transform_0, window_bounds = array<i64: 512, 256>}, {transform_indices = @transform_1, window_bounds = array<i64: 256, 128>}, {transform_indices = @transform_2, window_bounds = array<i64: 1, 128>}, {transform_indices = @transform_3, window_bounds = array<i64: 512, 128>}]} {
    %c0_i32 = arith.constant 0 : i32
    %0 = arith.cmpi eq, %arg2, %c0_i32 : i32
    %1 = arith.extui %0 : i1 to i32
    %c0_i32_0 = arith.constant 0 : i32
    %2 = arith.cmpi ne, %1, %c0_i32_0 : i32
    scf.if %2 {
      %cst_10 = arith.constant 0.000000e+00 : f32
      %12 = vector.broadcast %cst_10 : f32 to vector<512x128xf32>
      %c0_11 = arith.constant 0 : index
      %c0_12 = arith.constant 0 : index
      %13 = vector.load %arg7[%c0_11, %c0_12] : memref<512x128xf32, #tpu.memory_space<vmem>>, vector<512x128xf32>
      tpu.vector_store %arg7[%c0_11, %c0_12], %12 {strides = array<i32>} : memref<512x128xf32, #tpu.memory_space<vmem>>, vector<512x128xf32>,
    } else {
    }
    %c0 = arith.constant 0 : index
    %c0_1 = arith.constant 0 : index
    %3 = vector.load %arg7[%c0, %c0_1] : memref<512x128xf32, #tpu.memory_space<vmem>>, vector<512x128xf32>
    %c0_2 = arith.constant 0 : index
    %c0_3 = arith.constant 0 : index
    %4 = vector.load %arg3[%c0_2, %c0_3] : memref<512x256xbf16, #tpu.memory_space<vmem>>, vector<512x256xbf16>
    %c0_4 = arith.constant 0 : index
    %c0_5 = arith.constant 0 : index
    %5 = vector.load %arg4[%c0_4, %c0_5] : memref<256x128xbf16, #tpu.memory_space<vmem>>, vector<256x128xbf16>
    %cst = arith.constant dense<0.000000e+00> : vector<512x128xf32>
    %6 = tpu.matmul %4, %5, %cst {dimension_numbers = #tpu.dot_dimension_numbers<[1], [0], [0], [1], [0, 0, 1, 1], [], []>} : vector<512x256xbf16>, vector<256x128xbf16>, vector<512x128xf32> -> vector<512x128xf32>
    %7 = arith.addf %3, %6 : vector<512x128xf32>
    %c0_6 = arith.constant 0 : index
    %c0_7 = arith.constant 0 : index
    %8 = vector.load %arg7[%c0_6, %c0_7] : memref<512x128xf32, #tpu.memory_space<vmem>>, vector<512x128xf32>
    tpu.vector_store %arg7[%c0_6, %c0_7], %7 {strides = array<i32>} : memref<512x128xf32, #tpu.memory_space<vmem>>, vector<512x128xf32>,
    %c0_i32_8 = arith.constant 0 : i32
    %9 = arith.cmpi eq, %arg2, %c0_i32_8 : i32
    %10 = arith.extui %9 : i1 to i32
    %c0_i32_9 = arith.constant 0 : i32
    %11 = arith.cmpi ne, %10, %c0_i32_9 : i32
    scf.if %11 {
      %c0_10 = arith.constant 0 : index
      %c0_11 = arith.constant 0 : index
      %12 = vector.load %arg7[%c0_10, %c0_11] : memref<512x128xf32, #tpu.memory_space<vmem>>, vector<512x128xf32>
      %c0_12 = arith.constant 0 : index
      %c0_13 = arith.constant 0 : index
      %13 = vector.load %arg5[%c0_12, %c0_13] : memref<1x128xf32, #tpu.memory_space<vmem>>, vector<1x128xf32>
      %14 = vector.broadcast %13 : vector<1x128xf32> to vector<512x128xf32>
      %15 = arith.addf %12, %14 : vector<512x128xf32>
      %cst_14 = arith.constant 0.000000e+00 : f32
      %16 = vector.broadcast %cst_14 : f32 to vector<512x128xf32>
      %17 = arith.maximumf %15, %16 : vector<512x128xf32>
      %18 = arith.truncf %17 : vector<512x128xf32> to vector<512x128xbf16>
      %c0_15 = arith.constant 0 : index
      %c0_16 = arith.constant 0 : index
      %19 = vector.load %arg6[%c0_15, %c0_16] : memref<512x128xbf16, #tpu.memory_space<vmem>>, vector<512x128xbf16>
      tpu.vector_store %arg6[%c0_15, %c0_16], %18 {strides = array<i32>} : memref<512x128xbf16, #tpu.memory_space<vmem>>, vector<512x128xbf16>,
    } else {
    }
    return
  }
  func.func @transform_0(%arg0: i32, %arg1: i32, %arg2: i32) -> (i32, i32) {
    %c0_i32 = arith.constant 0 : i32
    return %arg0, %arg2 : i32, i32
  }
  func.func @transform_1(%arg0: i32, %arg1: i32, %arg2: i32) -> (i32, i32) {
    %c0_i32 = arith.constant 0 : i32
    return %arg2, %arg1 : i32, i32
  }
  func.func @transform_2(%arg0: i32, %arg1: i32, %arg2: i32) -> (i32, i32) {
    %c0_i32 = arith.constant 0 : i32
    %c0_i32_0 = arith.constant 0 : i32
    return %c0_i32, %arg1 : i32, i32
  }
  func.func @transform_3(%arg0: i32, %arg1: i32, %arg2: i32) -> (i32, i32) {
    %c0_i32 = arith.constant 0 : i32
    return %arg0, %arg1 : i32, i32
  }
}

</mosaic_0001>

<bundles_post_ra>
// kernel: conv_im2col_bn.1
= control target key start
LH: loop header
LB: loop body
LE: loop exit
PB: predicated region body
PF: predicated region fallthrough
CT: control target
= control target key end

     0   :  { %8 = vsyncpa [#allocation4], 0  ;;  %s2991_s0 = inlined_call_operand.vmem [shape: bf16[2048,256], index: 0, kind: input, shape index: {}]   ;;  %s2992_s1 = inlined_call_operand.vmem [shape: bf16[256,128], index: 1, kind: input, shape index: {}]   ;;  %s2993_s2 = inlined_call_operand.vmem [shape: f32[1,128], index: 2, kind: input, shape index: {}]   ;;  %s2994_s3 = inlined_call_operand.hbm [shape: bf16[2048,128], index: 3, kind: output, shape index: {}]  }
   0x1   :  { %10 = vsyncpa [#allocation4 + $0x1], 0  ;;  %s2609_s12 = smov 0   ;;  %s2611_s13 = smov 0  }
   0x2   :  { %s2613_s14 = smov 0   ;;  %s2615_s15 = smov 0  }
   0x3   :  { %s2617_s16 = smov 0   ;;  %s2619_s17 = smov 0  }
   0x4 LB: > { %s1824_s18 = sadd.s32 4294967295, %s2585_s17   ;;  %s1825_s19 = sadd.s32 4294967294, %s2585_s17   ;;  %s2585_s17 = sphi %s2619_s17, %s16_s17   ;;  %s2581_s16 = sphi %s2617_s16, %s3001_s16   ;;  %s2577_s15 = sphi %s2615_s15, %s3000_s15   ;;  %s2573_s14 = sphi %s2613_s14, %s2999_s14   ;;  %s2569_s13 = sphi %s2611_s13, %s2998_s13   ;;  %s2565_s12 = sphi %s2609_s12, %s2997_s12  }
   0x5   : > { %s35_s20 = sadd.s32 1, %s2581_s16  ;;  %s126_s21 = sadd.s32 1, %s2573_s14 }
   0x6   : > { %p37_p0 = scmp.ge.s32.totalorder %s35_s20, 4  ;;  %p136_p1 = scmp.ne.s32.totalorder %s2573_s14, %s2569_s13 }
   0x7   : > { %p137_p2 = scmp.eq.s32.totalorder %s1824_s18, 3  ;;  %p142_p3 = scmp.ne.s32.totalorder %s2569_s13, %s2565_s12 }
   0x8   : > { %s3003_s20 = smov (%p37_p0, %s35_s20), 0  ;;  %p143_p5 = scmp.eq.s32.totalorder %s1825_s19, 3 }
   0x9   : > { %p2649_p4 = por %p137_p2, %p136_p1  ;;  %s121_s23 = ssub.s32 %s2581_s16, %s3003_s20 }
   0xa   : > { %p1830_p6 = scmp.ge.s32.totalorder %s2585_s17, 1  ;;  %p124_p7 = scmp.eq.s32.totalorder %s121_s23, 0 }
   0xb   : > { %p2656_p8 = por %p143_p5, %p142_p3  ;;  %p194_p9 = scmp.lt.s32.totalorder %s2585_s17, 5 }
   0xc   : > { %s2662_s25 = scalar_select %p124_p7, %s2573_s14, %s126_s21  }
   0xd   : > { %p195_p10 = pnand %p1830_p6, %p194_p9 }
   0xe   : > { %s1832_s11 = sshll.u32 (!%p195_p10), %s2577_s15, 6  ;;  %s231_s4 = sand.u32 (!%p195_p10), 1, %s2569_s13  }
   0xf   : > { %198 = sbr.rel (%p195_p10) target bundleno = 445 (0x1bd), region = 32  ;;  %p236_p11 = scmp.lt.s32.totalorder (!%p195_p10), %s1832_s11, 255 }
  0x10   : > { %s1831_s5 = sshll.u32 (!%p195_p10), %s231_s4, 8  ;;  %s2527_s27 = scalar_lea.hbm (!%p195_p10), %s2994_s3, 1024 }
  0x11   : > { %s2809_s6 = scalar_lea.vmem (!%p195_p10), [#allocation3], %s1831_s5 }
  0x12   : > { %s1710_s18 = sshll.u32 (!%p195_p10), %s2809_s6, 4  ;;  %s1711_s18 = int_to_ptr.vmem [resolvable:$true] %s1710_s18 }
  0x14   : > { %v2232_v0 = vld [vmem:[%s2992_s1 + $0x38] sm:$0xff]  ;;  %v2231_v2 = vld [vmem:[%s2992_s1 + $0x30] sm:$0xff]  ;;  %v2230_v4 = vld [vmem:[%s2992_s1 + $0x28] sm:$0xff]  ;;  %s3005_s11 = smov (!%p236_p11, %s1832_s11), 255 }
  0x15   : > { %v2240_v1 = vld [vmem:[%s2992_s1 + $0x78] sm:$0xff]  ;;  %903 = vmatpush.bf16.msra.mxu0 %v2232_v0  ;;  %2433 = vmatpush.bf16.msra.mxu2 %v2232_v0  ;;  %v2239_v3 = vld [vmem:[%s2992_s1 + $0x70] sm:$0xff]  ;;  %v2238_v5 = vld [vmem:[%s2992_s1 + $0x68] sm:$0xff]  ;;  %s2160_s7 = sshll.u32 %s3005_s11, 3 }
  0x16   : > { %1072 = vmatpush.bf16.msra.mxu1 %v2240_v1  ;;  %2441 = vmatpush.bf16.msra.mxu3 %v2240_v1  ;;  %v2229_v6 = vld [vmem:[%s2992_s1 + $0x20] sm:$0xff]  ;;  %v2228_v8 = vld [vmem:[%s2992_s1 + $0x18] sm:$0xff]  ;;  %v2227_v10 = vld [vmem:[%s2992_s1 + $0x10] sm:$0xff]  ;;  %s2707_s19 = scalar_lea.vmem %s2991_s0, %s2160_s7  ;;  %s2241_s7 = sshll.u32 %s2577_s15, 8 }
  0x17   : > { %v2237_v7 = vld [vmem:[%s2992_s1 + $0x60] sm:$0xff]  ;;  %v2236_v9 = vld [vmem:[%s2992_s1 + $0x58] sm:$0xff]  ;;  %v2235_v11 = vld [vmem:[%s2992_s1 + $0x50] sm:$0xff]  ;;  %s1709_s10 = scalar_lea.hbm %s2994_s3, %s2241_s7 }
  0x18   : > { %v2226_v12 = vld [vmem:[%s2992_s1 + $0x8] sm:$0xff]  ;;  %v2225_v14 = vld [vmem:[%s2992_s1] sm:$0xff]  ;;  %v1845_v28 = vld [vmem:[%s2707_s19 + $0x10] sm:$0xf]  ;;  %s1712_s15 = sshll.u32 %s1709_s10, 4  ;;  %s1713_s15 = int_to_ptr.hbm [resolvable:$true] %s1712_s15 }
  0x19   : > { %904 = vmatpush.bf16.msra.mxu0 %v2231_v2  ;;  %2434 = vmatpush.bf16.msra.mxu2 %v2231_v2  ;;  %v2234_v13 = vld [vmem:[%s2992_s1 + $0x48] sm:$0xff]  ;;  %v2233_v15 = vld [vmem:[%s2992_s1 + $0x40] sm:$0xff]  ;;  %v2164_v29 = vld [vmem:[%s2707_s19 + $0x14] sm:$0xf0]  ;;  %s2521_s11 = sshra.s32 %s1713_s15, 4  ;;  %s2522_s11 = int_to_ptr.hbm [resolvable:$true] %s2521_s11 }
  0x1a   : > { %1073 = vmatpush.bf16.msra.mxu1 %v2239_v3  ;;  %2442 = vmatpush.bf16.msra.mxu3 %v2239_v3  ;;  %v1837_v16 = vld [vmem:[%s2707_s19] sm:$0xf]  ;;  %v2162_v17 = vld [vmem:[%s2707_s19 + $0x4] sm:$0xf0]  ;;  %v2161_v20 = vld [vmem:[%s2707_s19 + $0x4] sm:$0xf]  ;;  %v1846_v36 = vor.u32 %v2164_v29, %v1845_v28  ;;  %p2528_p1 = scmp.lt.s32.totalorder %s2522_s11, %s2994_s3 }
  0x1b   : > { %v1965_v18 = vld [vmem:[%s2707_s19 + $0x100] sm:$0xf]  ;;  %v2194_v19 = vld [vmem:[%s2707_s19 + $0x104] sm:$0xf0]  ;;  %v1839_v21 = vld [vmem:[%s2707_s19 + $0x8] sm:$0xf0]  ;;  %v1838_v24 = vor.u32 %v2162_v17, %v1837_v16 }
  0x1c   : > { %v2193_v22 = vld [vmem:[%s2707_s19 + $0x104] sm:$0xf]  ;;  %v1967_v23 = vld [vmem:[%s2707_s19 + $0x108] sm:$0xf0]  ;;  %v1966_v25 = vor.u32 %v2194_v19, %v1965_v18  ;;  %v1842_v26 = vor.u32 %v2161_v20, %v1839_v21  ;;  %v1973_v30 = vld [vmem:[%s2707_s19 + $0x110] sm:$0xf] }
  0x1d   : > { %905 = vmatpush.bf16.msra.mxu0 %v2230_v4  ;;  %2435 = vmatpush.bf16.msra.mxu2 %v2230_v4  ;;  %v1970_v27 = vor.u32 %v2193_v22, %v1967_v23  ;;  %v2196_v31 = vld [vmem:[%s2707_s19 + $0x114] sm:$0xf0]  ;;  %v2163_v32 = vld [vmem:[%s2707_s19 + $0x14] sm:$0xf]  ;;  %v1847_v33 = vld [vmem:[%s2707_s19 + $0x18] sm:$0xf0] }
  0x1e   : > { %1074 = vmatpush.bf16.msra.mxu1 %v2238_v5  ;;  %2443 = vmatpush.bf16.msra.mxu3 %v2238_v5  ;;  %v2195_v34 = vld [vmem:[%s2707_s19 + $0x114] sm:$0xf]  ;;  %v1975_v35 = vld [vmem:[%s2707_s19 + $0x118] sm:$0xf0]  ;;  %v1974_v37 = vor.u32 %v2196_v31, %v1973_v30  ;;  %v1850_v38 = vor.u32 %v2163_v32, %v1847_v33  ;;  %v1853_v40 = vld [vmem:[%s2707_s19 + $0x20] sm:$0xf] }
  0x1f   : > { %v1978_v39 = vor.u32 %v2195_v34, %v1975_v35  ;;  %v2166_v41 = vld [vmem:[%s2707_s19 + $0x24] sm:$0xf0]  ;;  %v1981_v42 = vld [vmem:[%s2707_s19 + $0x120] sm:$0xf]  ;;  %v2165_v44 = vld [vmem:[%s2707_s19 + $0x24] sm:$0xf] }
  0x20   : > { %v2198_v43 = vld [vmem:[%s2707_s19 + $0x124] sm:$0xf0]  ;;  %v1855_v45 = vld [vmem:[%s2707_s19 + $0x28] sm:$0xf0]  ;;  %v2197_v46 = vld [vmem:[%s2707_s19 + $0x124] sm:$0xf]  ;;  %v1854_v48 = vor.u32 %v2166_v41, %v1853_v40 }
  0x21   : > { %906 = vmatpush.bf16.msra.mxu0 %v2229_v6  ;;  %2436 = vmatpush.bf16.msra.mxu2 %v2229_v6  ;;  %v1983_v47 = vld [vmem:[%s2707_s19 + $0x128] sm:$0xf0]  ;;  %v1982_v49 = vor.u32 %v2198_v43, %v1981_v42  ;;  %v1858_v50 = vor.u32 %v2165_v44, %v1855_v45  ;;  %v1861_v52 = vld [vmem:[%s2707_s19 + $0x30] sm:$0xf]  ;;  %v2168_v53 = vld [vmem:[%s2707_s19 + $0x34] sm:$0xf0] }
  0x22   : > { %1075 = vmatpush.bf16.msra.mxu1 %v2237_v7  ;;  %2444 = vmatpush.bf16.msra.mxu3 %v2237_v7  ;;  %v1986_v51 = vor.u32 %v2197_v46, %v1983_v47  ;;  %v1989_v54 = vld [vmem:[%s2707_s19 + $0x130] sm:$0xf]  ;;  %v2200_v55 = vld [vmem:[%s2707_s19 + $0x134] sm:$0xf0]  ;;  %v2167_v56 = vld [vmem:[%s2707_s19 + $0x34] sm:$0xf]  ;;  %v1862_v60 = vor.u32 %v2168_v53, %v1861_v52 }
  0x23   : > { %v1863_v57 = vld [vmem:[%s2707_s19 + $0x38] sm:$0xf0]  ;;  %v2199_v58 = vld [vmem:[%s2707_s19 + $0x134] sm:$0xf]  ;;  %v1990_v61 = vor.u32 %v2200_v55, %v1989_v54  ;;  %v1869_v0 = vld [vmem:[%s2707_s19 + $0x40] sm:$0xf] }
  0x24   : > { %v1991_v59 = vld [vmem:[%s2707_s19 + $0x138] sm:$0xf0]  ;;  %v1866_v62 = vor.u32 %v2167_v56, %v1863_v57  ;;  %v2170_v1 = vld [vmem:[%s2707_s19 + $0x44] sm:$0xf0]  ;;  %v1997_v2 = vld [vmem:[%s2707_s19 + $0x140] sm:$0xf] }
  0x25   : > { %907 = vmatpush.bf16.msra.mxu0 %v2228_v8  ;;  %2437 = vmatpush.bf16.msra.mxu2 %v2228_v8  ;;  %v1994_v63 = vor.u32 %v2199_v58, %v1991_v59  ;;  %v2202_v3 = vld [vmem:[%s2707_s19 + $0x144] sm:$0xf0]  ;;  %v2169_v4 = vld [vmem:[%s2707_s19 + $0x44] sm:$0xf]  ;;  %v1871_v5 = vld [vmem:[%s2707_s19 + $0x48] sm:$0xf0]  ;;  %v1870_v8 = vor.u32 %v2170_v1, %v1869_v0 }
  0x26   : > { %1076 = vmatpush.bf16.msra.mxu1 %v2236_v9  ;;  %2445 = vmatpush.bf16.msra.mxu3 %v2236_v9  ;;  %v2201_v6 = vld [vmem:[%s2707_s19 + $0x144] sm:$0xf]  ;;  %v1999_v7 = vld [vmem:[%s2707_s19 + $0x148] sm:$0xf0]  ;;  %v1998_v9 = vor.u32 %v2202_v3, %v1997_v2  ;;  %v2171_v16 = vld [vmem:[%s2707_s19 + $0x54] sm:$0xf] }
  0x27   : > { %v1879_v17 = vld [vmem:[%s2707_s19 + $0x58] sm:$0xf0]  ;;  %v2203_v18 = vld [vmem:[%s2707_s19 + $0x154] sm:$0xf]  ;;  %v2173_v28 = vld [vmem:[%s2707_s19 + $0x64] sm:$0xf] }
  0x28   : > { %v2007_v19 = vld [vmem:[%s2707_s19 + $0x158] sm:$0xf0]  ;;  %v1882_v22 = vor.u32 %v2171_v16, %v1879_v17  ;;  %v1887_v29 = vld [vmem:[%s2707_s19 + $0x68] sm:$0xf0]  ;;  %v2205_v30 = vld [vmem:[%s2707_s19 + $0x164] sm:$0xf] }
  0x29   : > { %908 = vmatpush.bf16.msra.mxu0 %v2227_v10  ;;  %2438 = vmatpush.bf16.msra.mxu2 %v2227_v10  ;;  %v1874_v10 = vor.u32 %v2169_v4, %v1871_v5  ;;  %v2010_v23 = vor.u32 %v2203_v18, %v2007_v19  ;;  %v2015_v31 = vld [vmem:[%s2707_s19 + $0x168] sm:$0xf0]  ;;  %v1890_v34 = vor.u32 %v2173_v28, %v1887_v29  ;;  %v2175_v40 = vld [vmem:[%s2707_s19 + $0x74] sm:$0xf]  ;;  %v1895_v41 = vld [vmem:[%s2707_s19 + $0x78] sm:$0xf0] }
  0x2a   : > { %1077 = vmatpush.bf16.msra.mxu1 %v2235_v11  ;;  %2446 = vmatpush.bf16.msra.mxu3 %v2235_v11  ;;  %v2002_v11 = vor.u32 %v2201_v6, %v1999_v7  ;;  %v2018_v35 = vor.u32 %v2205_v30, %v2015_v31  ;;  %v2207_v42 = vld [vmem:[%s2707_s19 + $0x174] sm:$0xf]  ;;  %v2023_v43 = vld [vmem:[%s2707_s19 + $0x178] sm:$0xf0]  ;;  %v1898_v46 = vor.u32 %v2175_v40, %v1895_v41  ;;  %v2177_v52 = vld [vmem:[%s2707_s19 + $0x84] sm:$0xf] }
  0x2b   : > { %v2026_v47 = vor.u32 %v2207_v42, %v2023_v43  ;;  %v1903_v53 = vld [vmem:[%s2707_s19 + $0x88] sm:$0xf0]  ;;  %v2209_v54 = vld [vmem:[%s2707_s19 + $0x184] sm:$0xf]  ;;  %v1909_v6 = vld [vmem:[%s2707_s19 + $0x90] sm:$0xf] }
  0x2c   : > { %v2031_v55 = vld [vmem:[%s2707_s19 + $0x188] sm:$0xf0]  ;;  %v1906_v59 = vor.u32 %v2177_v52, %v1903_v53  ;;  %v2180_v7 = vld [vmem:[%s2707_s19 + $0x94] sm:$0xf0]  ;;  %v1917_v40 = vld [vmem:[%s2707_s19 + $0xa0] sm:$0xf] }
  0x2d   : > { %909 = vmatpush.bf16.msra.mxu0 %v2226_v12  ;;  %2439 = vmatpush.bf16.msra.mxu2 %v2226_v12  ;;  %v1877_v12 = vld [vmem:[%s2707_s19 + $0x50] sm:$0xf]  ;;  %v2182_v41 = vld [vmem:[%s2707_s19 + $0xa4] sm:$0xf0]  ;;  %v2045_v42 = vld [vmem:[%s2707_s19 + $0x1a0] sm:$0xf] }
  0x2e   : > { %1078 = vmatpush.bf16.msra.mxu1 %v2234_v13  ;;  %2447 = vmatpush.bf16.msra.mxu3 %v2234_v13  ;;  %v2172_v13 = vld [vmem:[%s2707_s19 + $0x54] sm:$0xf0]  ;;  %s2523_s21 = scalar_lea.hbm %s2522_s11, 256 }
  0x2f   : > { %v1878_v20 = vor.u32 %v2172_v13, %v1877_v12  ;;  %v2179_v12 = vld [vmem:[%s2707_s19 + $0x94] sm:$0xf]  ;;  %v1911_v13 = vld [vmem:[%s2707_s19 + $0x98] sm:$0xf0]  ;;  %p2524_p12 = scmp.ne.s32.totalorder %s2522_s11, %s2523_s21  ;;  %p2529_p2 = scmp.lt.s32.totalorder %s2527_s27, %s2523_s21 }
  0x31   : > { %910 = vmatpush.bf16.msra.mxu0 %v2225_v14  ;;  %2440 = vmatpush.bf16.msra.mxu2 %v2225_v14  ;;  %v2005_v14 = vld [vmem:[%s2707_s19 + $0x150] sm:$0xf]  ;;  %p2525_p13 = pnand %p2524_p12, %p2649_p4  ;;  %p2530_p3 = por %p2529_p2, %p2528_p1 }
  0x32   : > { %1079 = vmatpush.bf16.msra.mxu1 %v2233_v15  ;;  %2448 = vmatpush.bf16.msra.mxu3 %v2233_v15  ;;  %v2204_v15 = vld [vmem:[%s2707_s19 + $0x154] sm:$0xf0] }
  0x33   : > { %v2006_v21 = vor.u32 %v2204_v15, %v2005_v14  ;;  %v2211_v14 = vld [vmem:[%s2707_s19 + $0x194] sm:$0xf]  ;;  %v2039_v15 = vld [vmem:[%s2707_s19 + $0x198] sm:$0xf0]  ;;  %p2526_p0 = pneg %p2525_p13 }
  0x34   : > { %911 = vmatmul.bf16.vlgmr.msra.gmra.mxu0 %v1838_v24  ;;  %991 = vmatmul.bf16.vlgmr.msra.gmra.mxu2 %v1966_v25  ;;  %v1885_v24 = vld [vmem:[%s2707_s19 + $0x60] sm:$0xf]  ;;  %v2174_v25 = vld [vmem:[%s2707_s19 + $0x64] sm:$0xf0] }
  0x35   : > { %1080 = vmatmul.bf16.vlgmr.msra.gmra.mxu1 %v1842_v26  ;;  %1160 = vmatmul.bf16.vlgmr.msra.gmra.mxu3 %v1970_v27  ;;  %v2013_v26 = vld [vmem:[%s2707_s19 + $0x160] sm:$0xf]  ;;  %v2206_v27 = vld [vmem:[%s2707_s19 + $0x164] sm:$0xf0]  ;;  %v1886_v32 = vor.u32 %v2174_v25, %v1885_v24  ;;  %p2531_p5 = pnand %p2530_p3, %p2526_p0 }
  0x36   : > { %v2014_v33 = vor.u32 %v2206_v27, %v2013_v26  ;;  %v2042_v27 = vor.u32 %v2211_v14, %v2039_v15 }
  0x44   : > { %916 = vmatmul.bf16.gmra.mxu0 %v1846_v36  ;;  %996 = vmatmul.bf16.gmra.mxu2 %v1974_v37  ;;  %v1893_v36 = vld [vmem:[%s2707_s19 + $0x70] sm:$0xf]  ;;  %v2176_v37 = vld [vmem:[%s2707_s19 + $0x74] sm:$0xf0] }
  0x45   : > { %1085 = vmatmul.bf16.gmra.mxu1 %v1850_v38  ;;  %1165 = vmatmul.bf16.gmra.mxu3 %v1978_v39  ;;  %v2021_v38 = vld [vmem:[%s2707_s19 + $0x170] sm:$0xf]  ;;  %v2208_v39 = vld [vmem:[%s2707_s19 + $0x174] sm:$0xf0]  ;;  %v1894_v44 = vor.u32 %v2176_v37, %v1893_v36 }
  0x46   : > { %v2022_v45 = vor.u32 %v2208_v39, %v2021_v38 }
  0x54   : > { %921 = vmatmul.bf16.gmra.mxu0 %v1854_v48  ;;  %1001 = vmatmul.bf16.gmra.mxu2 %v1982_v49  ;;  %v1901_v48 = vld [vmem:[%s2707_s19 + $0x80] sm:$0xf]  ;;  %v2178_v49 = vld [vmem:[%s2707_s19 + $0x84] sm:$0xf0] }
  0x55   : > { %1090 = vmatmul.bf16.gmra.mxu1 %v1858_v50  ;;  %1170 = vmatmul.bf16.gmra.mxu3 %v1986_v51  ;;  %v2029_v50 = vld [vmem:[%s2707_s19 + $0x180] sm:$0xf]  ;;  %v2210_v51 = vld [vmem:[%s2707_s19 + $0x184] sm:$0xf0]  ;;  %v1902_v56 = vor.u32 %v2178_v49, %v1901_v48  ;;  %v2213_v48 = vld [vmem:[%s2707_s19 + $0x1a4] sm:$0xf] }
  0x56   : > { %v2030_v57 = vor.u32 %v2210_v51, %v2029_v50  ;;  %v2047_v49 = vld [vmem:[%s2707_s19 + $0x1a8] sm:$0xf0] }
  0x64   : > { %926 = vmatmul.bf16.gmra.mxu0 %v1862_v60  ;;  %1006 = vmatmul.bf16.gmra.mxu2 %v1990_v61  ;;  %v2034_v60 = vor.u32 %v2209_v54, %v2031_v55  ;;  %v1918_v54 = vor.u32 %v2182_v41, %v1917_v40 }
  0x65   : > { %1095 = vmatmul.bf16.gmra.mxu1 %v1866_v62  ;;  %1175 = vmatmul.bf16.gmra.mxu3 %v1994_v63  ;;  %v2793_v63 = vld [vmem:[%s2993_s2] ss:$0 sm:$0xff] }
  0x74   : > { %931 = vmatmul.bf16.gmra.mxu0 %v1870_v8  ;;  %1011 = vmatmul.bf16.gmra.mxu2 %v1998_v9  ;;  %v2037_v8 = vld [vmem:[%s2707_s19 + $0x190] sm:$0xf] }
  0x75   : > { %1100 = vmatmul.bf16.gmra.mxu1 %v1874_v10  ;;  %1180 = vmatmul.bf16.gmra.mxu3 %v2002_v11  ;;  %v2212_v11 = vld [vmem:[%s2707_s19 + $0x194] sm:$0xf0] }
  0x84   : > { %936 = vmatmul.bf16.gmra.mxu0 %v1878_v20  ;;  %1016 = vmatmul.bf16.gmra.mxu2 %v2006_v21  ;;  %v1910_v20 = vor.u32 %v2180_v7, %v1909_v6  ;;  %v2038_v21 = vor.u32 %v2212_v11, %v2037_v8  ;;  %v1925_v11 = vld [vmem:[%s2707_s19 + $0xb0] sm:$0xf] }
  0x85   : > { %1105 = vmatmul.bf16.gmra.mxu1 %v1882_v22  ;;  %1185 = vmatmul.bf16.gmra.mxu3 %v2010_v23  ;;  %v1914_v22 = vor.u32 %v2179_v12, %v1911_v13  ;;  %v2184_v12 = vld [vmem:[%s2707_s19 + $0xb4] sm:$0xf0]  ;;  %v2053_v13 = vld [vmem:[%s2707_s19 + $0x1b0] sm:$0xf] }
  0x94   : > { %941 = vmatmul.bf16.gmra.mxu0 %v1886_v32  ;;  %1021 = vmatmul.bf16.gmra.mxu2 %v2014_v33 }
  0x95   : > { %1110 = vmatmul.bf16.gmra.mxu1 %v1890_v34  ;;  %1190 = vmatmul.bf16.gmra.mxu3 %v2018_v35 }
  0xa4   : > { %946 = vmatmul.bf16.gmra.mxu0 %v1894_v44  ;;  %1026 = vmatmul.bf16.gmra.mxu2 %v2022_v45  ;;  %v2214_v45 = vld [vmem:[%s2707_s19 + $0x1a4] sm:$0xf0] }
  0xa5   : > { %1115 = vmatmul.bf16.gmra.mxu1 %v1898_v46  ;;  %1195 = vmatmul.bf16.gmra.mxu3 %v2026_v47  ;;  %v2181_v46 = vld [vmem:[%s2707_s19 + $0xa4] sm:$0xf]  ;;  %v1919_v47 = vld [vmem:[%s2707_s19 + $0xa8] sm:$0xf0]  ;;  %v2046_v55 = vor.u32 %v2214_v45, %v2045_v42  ;;  %v1933_v45 = vld [vmem:[%s2707_s19 + $0xc0] sm:$0xf] }
  0xb1   : > { %v912_v58 = vpop.f32.mrf.mxu0 }
  0xb2   : > { %v1081_v61 = vpop.f32.mrf.mxu1 }
  0xb3   : > { %v1082_v62 = vadd.f32 %v1081_v61, %v912_v58  ;;  %v2050_v61 = vor.u32 %v2213_v48, %v2047_v49 }
  0xb4   : > { %951 = vmatmul.bf16.gmra.mxu0 %v1902_v56  ;;  %1031 = vmatmul.bf16.gmra.mxu2 %v2030_v57  ;;  %v1922_v56 = vor.u32 %v2181_v46, %v1919_v47  ;;  %v2186_v46 = vld [vmem:[%s2707_s19 + $0xc4] sm:$0xf0]  ;;  %v2061_v47 = vld [vmem:[%s2707_s19 + $0x1c0] sm:$0xf] }
  0xb5   : > { %1120 = vmatmul.bf16.gmra.mxu1 %v1906_v59  ;;  %1200 = vmatmul.bf16.gmra.mxu3 %v2034_v60  ;;  %v1440_v4 = vadd.f32 %v2793_v63, %v1082_v62 }
  0xb7   : > { %v992_v0 = vpop.f32.mrf.mxu2  ;;  %v1504_v16 = vmax.f32 %v1440_v4, 0.0 }
  0xb8   : > { %v1161_v1 = vpop.f32.mrf.mxu3 }
  0xb9   : > { %v914_v2 = vpop.f32.mrf.mxu0  ;;  %v1162_v9 = vadd.f32 %v1161_v1, %v992_v0 }
  0xba   : > { %v1083_v3 = vpop.f32.mrf.mxu1 }
  0xbb   : > { %v1084_v5 = vadd.f32 %v1083_v3, %v914_v2  ;;  %v1472_v23 = vadd.f32 %v2793_v63, %v1162_v9 }
  0xbd   : > { %v1441_v10 = vadd.f32 %v2793_v63, %v1084_v5  ;;  %v1536_v30 = vmax.f32 %v1472_v23, 0.0 }
  0xbf   : > { %v1505_v17 = vmax.f32 %v1441_v10, 0.0  ;;  %v994_v18 = vpop.f32.mrf.mxu2 }
  0xc0   : > { %v1163_v19 = vpop.f32.mrf.mxu3 }
  0xc1   : > { %v2245_v24 = vpack.c.bf16 %v1505_v17, %v1504_v16  ;;  %v1164_v25 = vadd.f32 %v1163_v19, %v994_v18  ;;  %v917_v26 = vpop.f32.mrf.mxu0  ;;  %v2216_v16 = vld [vmem:[%s2707_s19 + $0x1b4] sm:$0xf0]  ;;  %v2183_v17 = vld [vmem:[%s2707_s19 + $0xb4] sm:$0xf]  ;;  %v1927_v18 = vld [vmem:[%s2707_s19 + $0xb8] sm:$0xf0] }
  0xc2   : > { %v1086_v28 = vpop.f32.mrf.mxu1  ;;  %v2215_v19 = vld [vmem:[%s2707_s19 + $0x1b4] sm:$0xf] }
  0xc3   : > { %2246 = vst [vmem:[%s2809_s6] sm:$0xff] %v2245_v24   ;;  %v1473_v29 = vadd.f32 %v2793_v63, %v1164_v25  ;;  %v1087_v33 = vadd.f32 %v1086_v28, %v917_v26  ;;  %v1926_v25 = vor.u32 %v2184_v12, %v1925_v11  ;;  %v2054_v26 = vor.u32 %v2216_v16, %v2053_v13  ;;  %v1941_v16 = vld [vmem:[%s2707_s19 + $0xd0] sm:$0xf] }
  0xc4   : > { %956 = vmatmul.bf16.gmra.mxu0 %v1910_v20  ;;  %1036 = vmatmul.bf16.gmra.mxu2 %v2038_v21  ;;  %v2055_v20 = vld [vmem:[%s2707_s19 + $0x1b8] sm:$0xf0] }
  0xc5   : > { %v1537_v31 = vmax.f32 %v1473_v29, 0.0  ;;  %1125 = vmatmul.bf16.gmra.mxu1 %v1914_v22  ;;  %1205 = vmatmul.bf16.gmra.mxu3 %v2042_v27  ;;  %v1442_v38 = vadd.f32 %v2793_v63, %v1087_v33  ;;  %v1930_v27 = vor.u32 %v2183_v17, %v1927_v18  ;;  %v2188_v17 = vld [vmem:[%s2707_s19 + $0xd4] sm:$0xf0]  ;;  %v2069_v18 = vld [vmem:[%s2707_s19 + $0x1d0] sm:$0xf] }
  0xc7   : > { %v2325_v32 = vpack.c.bf16 %v1537_v31, %v1536_v30  ;;  %v997_v34 = vpop.f32.mrf.mxu2  ;;  %v1506_v50 = vmax.f32 %v1442_v38, 0.0 }
  0xc8   : > { %v1166_v35 = vpop.f32.mrf.mxu3 }
  0xc9   : > { %2417 = vst [vmem:[%s2809_s6 + $0x80] sm:$0xff] %v2325_v32   ;;  %v919_v36 = vpop.f32.mrf.mxu0  ;;  %v1167_v43 = vadd.f32 %v1166_v35, %v997_v34  ;;  %v2058_v32 = vor.u32 %v2215_v19, %v2055_v20 }
  0xca   : > { %v1088_v37 = vpop.f32.mrf.mxu1 }
  0xcb   : > { %v1089_v39 = vadd.f32 %v1088_v37, %v919_v36  ;;  %v1474_v57 = vadd.f32 %v2793_v63, %v1167_v43 }
  0xcd   : > { %v1443_v44 = vadd.f32 %v2793_v63, %v1089_v39  ;;  %v1538_v1 = vmax.f32 %v1474_v57, 0.0 }
  0xcf   : > { %v1507_v51 = vmax.f32 %v1443_v44, 0.0  ;;  %v999_v52 = vpop.f32.mrf.mxu2 }
  0xd0   : > { %v1168_v53 = vpop.f32.mrf.mxu3 }
  0xd1   : > { %v2250_v58 = vpack.c.bf16 %v1507_v51, %v1506_v50  ;;  %v1169_v59 = vadd.f32 %v1168_v53, %v999_v52  ;;  %v922_v60 = vpop.f32.mrf.mxu0  ;;  %v2218_v50 = vld [vmem:[%s2707_s19 + $0x1c4] sm:$0xf0]  ;;  %v2185_v51 = vld [vmem:[%s2707_s19 + $0xc4] sm:$0xf]  ;;  %v1935_v52 = vld [vmem:[%s2707_s19 + $0xc8] sm:$0xf0] }
  0xd2   : > { %v1091_v62 = vpop.f32.mrf.mxu1  ;;  %v2217_v53 = vld [vmem:[%s2707_s19 + $0x1c4] sm:$0xf] }
  0xd3   : > { %2402 = vst [vmem:[%s2809_s6 + $0x8] sm:$0xff] %v2250_v58   ;;  %v1475_v0 = vadd.f32 %v2793_v63, %v1169_v59  ;;  %v1092_v4 = vadd.f32 %v1091_v62, %v922_v60  ;;  %v1934_v59 = vor.u32 %v2186_v46, %v1933_v45  ;;  %v2062_v60 = vor.u32 %v2218_v50, %v2061_v47  ;;  %v1949_v50 = vld [vmem:[%s2707_s19 + $0xe0] sm:$0xf] }
  0xd4   : > { %961 = vmatmul.bf16.gmra.mxu0 %v1918_v54  ;;  %1041 = vmatmul.bf16.gmra.mxu2 %v2046_v55  ;;  %v2063_v54 = vld [vmem:[%s2707_s19 + $0x1c8] sm:$0xf0] }
  0xd5   : > { %v1539_v2 = vmax.f32 %v1475_v0, 0.0  ;;  %1130 = vmatmul.bf16.gmra.mxu1 %v1922_v56  ;;  %1210 = vmatmul.bf16.gmra.mxu3 %v2050_v61  ;;  %v1444_v9 = vadd.f32 %v2793_v63, %v1092_v4  ;;  %v1938_v61 = vor.u32 %v2185_v51, %v1935_v52  ;;  %v2190_v51 = vld [vmem:[%s2707_s19 + $0xe4] sm:$0xf0]  ;;  %v2077_v52 = vld [vmem:[%s2707_s19 + $0x1e0] sm:$0xf] }
  0xd7   : > { %v2330_v3 = vpack.c.bf16 %v1539_v2, %v1538_v1  ;;  %v1002_v5 = vpop.f32.mrf.mxu2  ;;  %v1508_v21 = vmax.f32 %v1444_v9, 0.0 }
  0xd8   : > { %v1171_v6 = vpop.f32.mrf.mxu3 }
  0xd9   : > { %2418 = vst [vmem:[%s2809_s6 + $0x88] sm:$0xff] %v2330_v3   ;;  %v924_v7 = vpop.f32.mrf.mxu0  ;;  %v1172_v14 = vadd.f32 %v1171_v6, %v1002_v5  ;;  %v2066_v3 = vor.u32 %v2217_v53, %v2063_v54 }
  0xda   : > { %v1093_v8 = vpop.f32.mrf.mxu1 }
  0xdb   : > { %v1094_v10 = vadd.f32 %v1093_v8, %v924_v7  ;;  %v1476_v28 = vadd.f32 %v2793_v63, %v1172_v14 }
  0xdd   : > { %v1445_v15 = vadd.f32 %v2793_v63, %v1094_v10  ;;  %v1540_v35 = vmax.f32 %v1476_v28, 0.0 }
  0xdf   : > { %v1509_v22 = vmax.f32 %v1445_v15, 0.0  ;;  %v1004_v23 = vpop.f32.mrf.mxu2 }
  0xe0   : > { %v1173_v24 = vpop.f32.mrf.mxu3 }
  0xe1   : > { %v2255_v29 = vpack.c.bf16 %v1509_v22, %v1508_v21  ;;  %v1174_v30 = vadd.f32 %v1173_v24, %v1004_v23  ;;  %v927_v31 = vpop.f32.mrf.mxu0  ;;  %v2220_v21 = vld [vmem:[%s2707_s19 + $0x1d4] sm:$0xf0]  ;;  %v2187_v22 = vld [vmem:[%s2707_s19 + $0xd4] sm:$0xf]  ;;  %v1943_v23 = vld [vmem:[%s2707_s19 + $0xd8] sm:$0xf0] }
  0xe2   : > { %v1096_v33 = vpop.f32.mrf.mxu1  ;;  %v2219_v24 = vld [vmem:[%s2707_s19 + $0x1d4] sm:$0xf] }
  0xe3   : > { %2403 = vst [vmem:[%s2809_s6 + $0x10] sm:$0xff] %v2255_v29   ;;  %v1477_v34 = vadd.f32 %v2793_v63, %v1174_v30  ;;  %v1097_v38 = vadd.f32 %v1096_v33, %v927_v31  ;;  %v1942_v30 = vor.u32 %v2188_v17, %v1941_v16  ;;  %v2070_v31 = vor.u32 %v2220_v21, %v2069_v18  ;;  %v1957_v21 = vld [vmem:[%s2707_s19 + $0xf0] sm:$0xf] }
  0xe4   : > { %966 = vmatmul.bf16.gmra.mxu0 %v1926_v25  ;;  %1046 = vmatmul.bf16.gmra.mxu2 %v2054_v26  ;;  %v2071_v25 = vld [vmem:[%s2707_s19 + $0x1d8] sm:$0xf0] }
  0xe5   : > { %v1541_v36 = vmax.f32 %v1477_v34, 0.0  ;;  %1135 = vmatmul.bf16.gmra.mxu1 %v1930_v27  ;;  %1215 = vmatmul.bf16.gmra.mxu3 %v2058_v32  ;;  %v1446_v43 = vadd.f32 %v2793_v63, %v1097_v38  ;;  %v1946_v32 = vor.u32 %v2187_v22, %v1943_v23  ;;  %v2192_v22 = vld [vmem:[%s2707_s19 + $0xf4] sm:$0xf0]  ;;  %v2085_v23 = vld [vmem:[%s2707_s19 + $0x1f0] sm:$0xf] }
  0xe7   : > { %v2335_v37 = vpack.c.bf16 %v1541_v36, %v1540_v35  ;;  %v1007_v39 = vpop.f32.mrf.mxu2  ;;  %v1510_v55 = vmax.f32 %v1446_v43, 0.0 }
  0xe8   : > { %v1176_v40 = vpop.f32.mrf.mxu3 }
  0xe9   : > { %2419 = vst [vmem:[%s2809_s6 + $0x90] sm:$0xff] %v2335_v37   ;;  %v929_v41 = vpop.f32.mrf.mxu0  ;;  %v1177_v48 = vadd.f32 %v1176_v40, %v1007_v39  ;;  %v2074_v37 = vor.u32 %v2219_v24, %v2071_v25 }
  0xea   : > { %v1098_v42 = vpop.f32.mrf.mxu1 }
  0xeb   : > { %v1099_v44 = vadd.f32 %v1098_v42, %v929_v41  ;;  %v1478_v62 = vadd.f32 %v2793_v63, %v1177_v48 }
  0xed   : > { %v1447_v49 = vadd.f32 %v2793_v63, %v1099_v44  ;;  %v1542_v6 = vmax.f32 %v1478_v62, 0.0 }
  0xef   : > { %v1511_v56 = vmax.f32 %v1447_v49, 0.0  ;;  %v1009_v57 = vpop.f32.mrf.mxu2 }
  0xf0   : > { %v1178_v58 = vpop.f32.mrf.mxu3 }
  0xf1   : > { %v2260_v0 = vpack.c.bf16 %v1511_v56, %v1510_v55  ;;  %v1179_v1 = vadd.f32 %v1178_v58, %v1009_v57  ;;  %v932_v2 = vpop.f32.mrf.mxu0  ;;  %v2222_v55 = vld [vmem:[%s2707_s19 + $0x1e4] sm:$0xf0]  ;;  %v2189_v56 = vld [vmem:[%s2707_s19 + $0xe4] sm:$0xf]  ;;  %v1951_v57 = vld [vmem:[%s2707_s19 + $0xe8] sm:$0xf0] }
  0xf2   : > { %v1101_v4 = vpop.f32.mrf.mxu1  ;;  %v2221_v58 = vld [vmem:[%s2707_s19 + $0x1e4] sm:$0xf] }
  0xf3   : > { %2404 = vst [vmem:[%s2809_s6 + $0x18] sm:$0xff] %v2260_v0   ;;  %v1479_v5 = vadd.f32 %v2793_v63, %v1179_v1  ;;  %v1102_v9 = vadd.f32 %v1101_v4, %v932_v2  ;;  %v1950_v1 = vor.u32 %v2190_v51, %v1949_v50  ;;  %v2078_v2 = vor.u32 %v2222_v55, %v2077_v52 }
  0xf4   : > { %971 = vmatmul.bf16.gmra.mxu0 %v1934_v59  ;;  %1051 = vmatmul.bf16.gmra.mxu2 %v2062_v60  ;;  %v2079_v59 = vld [vmem:[%s2707_s19 + $0x1e8] sm:$0xf0] }
  0xf5   : > { %v1543_v7 = vmax.f32 %v1479_v5, 0.0  ;;  %1140 = vmatmul.bf16.gmra.mxu1 %v1938_v61  ;;  %1220 = vmatmul.bf16.gmra.mxu3 %v2066_v3  ;;  %v1448_v14 = vadd.f32 %v2793_v63, %v1102_v9  ;;  %v1954_v3 = vor.u32 %v2189_v56, %v1951_v57 }
  0xf7   : > { %v2340_v8 = vpack.c.bf16 %v1543_v7, %v1542_v6  ;;  %v1012_v10 = vpop.f32.mrf.mxu2  ;;  %v1512_v26 = vmax.f32 %v1448_v14, 0.0 }
  0xf8   : > { %v1181_v11 = vpop.f32.mrf.mxu3 }
  0xf9   : > { %2420 = vst [vmem:[%s2809_s6 + $0x98] sm:$0xff] %v2340_v8   ;;  %v934_v12 = vpop.f32.mrf.mxu0  ;;  %v1182_v19 = vadd.f32 %v1181_v11, %v1012_v10  ;;  %v2082_v8 = vor.u32 %v2221_v58, %v2079_v59 }
  0xfa   : > { %v1103_v13 = vpop.f32.mrf.mxu1 }
  0xfb   : > { %v1104_v15 = vadd.f32 %v1103_v13, %v934_v12  ;;  %v1480_v33 = vadd.f32 %v2793_v63, %v1182_v19 }
  0xfd   : > { %v1449_v20 = vadd.f32 %v2793_v63, %v1104_v15  ;;  %v1544_v40 = vmax.f32 %v1480_v33, 0.0 }
  0xff   : > { %v1513_v27 = vmax.f32 %v1449_v20, 0.0  ;;  %v1014_v28 = vpop.f32.mrf.mxu2 }
 0x100   : > { %v1183_v29 = vpop.f32.mrf.mxu3 }
 0x101   : > { %v2265_v34 = vpack.c.bf16 %v1513_v27, %v1512_v26  ;;  %v1184_v35 = vadd.f32 %v1183_v29, %v1014_v28  ;;  %v937_v36 = vpop.f32.mrf.mxu0  ;;  %v2224_v26 = vld [vmem:[%s2707_s19 + $0x1f4] sm:$0xf0]  ;;  %v2191_v27 = vld [vmem:[%s2707_s19 + $0xf4] sm:$0xf]  ;;  %v1959_v28 = vld [vmem:[%s2707_s19 + $0xf8] sm:$0xf0] }
 0x102   : > { %v1106_v38 = vpop.f32.mrf.mxu1  ;;  %v2223_v29 = vld [vmem:[%s2707_s19 + $0x1f4] sm:$0xf] }
 0x103   : > { %2405 = vst [vmem:[%s2809_s6 + $0x20] sm:$0xff] %v2265_v34   ;;  %v1481_v39 = vadd.f32 %v2793_v63, %v1184_v35  ;;  %v1107_v43 = vadd.f32 %v1106_v38, %v937_v36  ;;  %v1958_v35 = vor.u32 %v2192_v22, %v1957_v21  ;;  %v2086_v36 = vor.u32 %v2224_v26, %v2085_v23 }
 0x104   : > { %976 = vmatmul.bf16.gmra.mxu0 %v1942_v30  ;;  %1056 = vmatmul.bf16.gmra.mxu2 %v2070_v31  ;;  %v2087_v30 = vld [vmem:[%s2707_s19 + $0x1f8] sm:$0xf0]  ;;  %s1697_s19 = scalar_lea.sflag [#allocation4], %s231_s4 }
 0x105   : > { %v1545_v41 = vmax.f32 %v1481_v39, 0.0  ;;  %1145 = vmatmul.bf16.gmra.mxu1 %v1946_v32  ;;  %1225 = vmatmul.bf16.gmra.mxu3 %v2074_v37  ;;  %v1450_v48 = vadd.f32 %v2793_v63, %v1107_v43  ;;  %v1962_v37 = vor.u32 %v2191_v27, %v1959_v28 }
 0x107   : > { %v2345_v42 = vpack.c.bf16 %v1545_v41, %v1544_v40  ;;  %v1017_v44 = vpop.f32.mrf.mxu2  ;;  %v1514_v60 = vmax.f32 %v1450_v48, 0.0 }
 0x108   : > { %v1186_v45 = vpop.f32.mrf.mxu3 }
 0x109   : > { %2421 = vst [vmem:[%s2809_s6 + $0xa0] sm:$0xff] %v2345_v42   ;;  %v939_v46 = vpop.f32.mrf.mxu0  ;;  %v1187_v53 = vadd.f32 %v1186_v45, %v1017_v44  ;;  %v2090_v42 = vor.u32 %v2223_v29, %v2087_v30 }
 0x10a   : > { %v1108_v47 = vpop.f32.mrf.mxu1 }
 0x10b   : > { %v1109_v49 = vadd.f32 %v1108_v47, %v939_v46  ;;  %v1482_v4 = vadd.f32 %v2793_v63, %v1187_v53 }
 0x10d   : > { %v1451_v54 = vadd.f32 %v2793_v63, %v1109_v49  ;;  %v1546_v11 = vmax.f32 %v1482_v4, 0.0 }
 0x10f   : > { %v1515_v61 = vmax.f32 %v1451_v54, 0.0  ;;  %v1019_v62 = vpop.f32.mrf.mxu2 }
 0x110   : > { %v1188_v0 = vpop.f32.mrf.mxu3 }
 0x111   : > { %v2270_v5 = vpack.c.bf16 %v1515_v61, %v1514_v60  ;;  %v1189_v6 = vadd.f32 %v1188_v0, %v1019_v62  ;;  %v942_v7 = vpop.f32.mrf.mxu0 }
 0x112   : > { %v1111_v9 = vpop.f32.mrf.mxu1 }
 0x113   : > { %2406 = vst [vmem:[%s2809_s6 + $0x28] sm:$0xff] %v2270_v5   ;;  %v1483_v10 = vadd.f32 %v2793_v63, %v1189_v6  ;;  %v1112_v14 = vadd.f32 %v1111_v9, %v942_v7 }
 0x114   : > { %981 = vmatmul.bf16.gmra.mxu0 %v1950_v1  ;;  %1061 = vmatmul.bf16.gmra.mxu2 %v2078_v2 }
 0x115   : > { %v1547_v12 = vmax.f32 %v1483_v10, 0.0  ;;  %1150 = vmatmul.bf16.gmra.mxu1 %v1954_v3  ;;  %1230 = vmatmul.bf16.gmra.mxu3 %v2082_v8  ;;  %v1452_v19 = vadd.f32 %v2793_v63, %v1112_v14 }
 0x117   : > { %v2350_v13 = vpack.c.bf16 %v1547_v12, %v1546_v11  ;;  %v1022_v15 = vpop.f32.mrf.mxu2  ;;  %v1516_v31 = vmax.f32 %v1452_v19, 0.0 }
 0x118   : > { %v1191_v16 = vpop.f32.mrf.mxu3 }
 0x119   : > { %2422 = vst [vmem:[%s2809_s6 + $0xa8] sm:$0xff] %v2350_v13   ;;  %v944_v17 = vpop.f32.mrf.mxu0  ;;  %v1192_v24 = vadd.f32 %v1191_v16, %v1022_v15 }
 0x11a   : > { %v1113_v18 = vpop.f32.mrf.mxu1 }
 0x11b   : > { %v1114_v20 = vadd.f32 %v1113_v18, %v944_v17  ;;  %v1484_v38 = vadd.f32 %v2793_v63, %v1192_v24 }
 0x11d   : > { %v1453_v25 = vadd.f32 %v2793_v63, %v1114_v20  ;;  %v1548_v45 = vmax.f32 %v1484_v38, 0.0 }
 0x11f   : > { %v1517_v32 = vmax.f32 %v1453_v25, 0.0  ;;  %v1024_v33 = vpop.f32.mrf.mxu2 }
 0x120   : > { %v1193_v34 = vpop.f32.mrf.mxu3 }
 0x121   : > { %v2275_v39 = vpack.c.bf16 %v1517_v32, %v1516_v31  ;;  %v1194_v40 = vadd.f32 %v1193_v34, %v1024_v33  ;;  %v947_v41 = vpop.f32.mrf.mxu0 }
 0x122   : > { %v1116_v43 = vpop.f32.mrf.mxu1 }
 0x123   : > { %2407 = vst [vmem:[%s2809_s6 + $0x30] sm:$0xff] %v2275_v39   ;;  %v1485_v44 = vadd.f32 %v2793_v63, %v1194_v40  ;;  %v1117_v48 = vadd.f32 %v1116_v43, %v947_v41 }
 0x124   : > { %986 = vmatmul.bf16.gmra.mxu0 %v1958_v35  ;;  %1066 = vmatmul.bf16.gmra.mxu2 %v2086_v36 }
 0x125   : > { %v1549_v46 = vmax.f32 %v1485_v44, 0.0  ;;  %1155 = vmatmul.bf16.gmra.mxu1 %v1962_v37  ;;  %1235 = vmatmul.bf16.gmra.mxu3 %v2090_v42  ;;  %v1454_v53 = vadd.f32 %v2793_v63, %v1117_v48 }
 0x127   : > { %v2355_v47 = vpack.c.bf16 %v1549_v46, %v1548_v45  ;;  %v1027_v49 = vpop.f32.mrf.mxu2  ;;  %v1518_v57 = vmax.f32 %v1454_v53, 0.0 }
 0x128   : > { %v1196_v50 = vpop.f32.mrf.mxu3 }
 0x129   : > { %2423 = vst [vmem:[%s2809_s6 + $0xb0] sm:$0xff] %v2355_v47   ;;  %v949_v51 = vpop.f32.mrf.mxu0  ;;  %v1197_v55 = vadd.f32 %v1196_v50, %v1027_v49 }
 0x12a   : > { %v1118_v52 = vpop.f32.mrf.mxu1 }
 0x12b   : > { %v1119_v54 = vadd.f32 %v1118_v52, %v949_v51  ;;  %v1486_v61 = vadd.f32 %v2793_v63, %v1197_v55 }
 0x12d   : > { %v1455_v56 = vadd.f32 %v2793_v63, %v1119_v54  ;;  %v1550_v4 = vmax.f32 %v1486_v61, 0.0 }
 0x12f   : > { %v1519_v58 = vmax.f32 %v1455_v56, 0.0  ;;  %v1029_v59 = vpop.f32.mrf.mxu2 }
 0x130   : > { %v1198_v60 = vpop.f32.mrf.mxu3 }
 0x131   : > { %v2280_v62 = vpack.c.bf16 %v1519_v58, %v1518_v57  ;;  %v1199_v0 = vadd.f32 %v1198_v60, %v1029_v59  ;;  %v952_v1 = vpop.f32.mrf.mxu0 }
 0x132   : > { %v1121_v2 = vpop.f32.mrf.mxu1 }
 0x133   : > { %2408 = vst [vmem:[%s2809_s6 + $0x38] sm:$0xff] %v2280_v62   ;;  %v1487_v3 = vadd.f32 %v2793_v63, %v1199_v0  ;;  %v1122_v7 = vadd.f32 %v1121_v2, %v952_v1 }
 0x135   : > { %v1551_v5 = vmax.f32 %v1487_v3, 0.0  ;;  %v1456_v12 = vadd.f32 %v2793_v63, %v1122_v7 }
 0x137   : > { %v2360_v6 = vpack.c.bf16 %v1551_v5, %v1550_v4  ;;  %v1032_v8 = vpop.f32.mrf.mxu2  ;;  %v1520_v16 = vmax.f32 %v1456_v12, 0.0 }
 0x138   : > { %v1201_v9 = vpop.f32.mrf.mxu3 }
 0x139   : > { %2424 = vst [vmem:[%s2809_s6 + $0xb8] sm:$0xff] %v2360_v6   ;;  %v954_v10 = vpop.f32.mrf.mxu0  ;;  %v1202_v14 = vadd.f32 %v1201_v9, %v1032_v8 }
 0x13a   : > { %v1123_v11 = vpop.f32.mrf.mxu1 }
 0x13b   : > { %v1124_v13 = vadd.f32 %v1123_v11, %v954_v10  ;;  %v1488_v20 = vadd.f32 %v2793_v63, %v1202_v14 }
 0x13d   : > { %v1457_v15 = vadd.f32 %v2793_v63, %v1124_v13  ;;  %v1552_v26 = vmax.f32 %v1488_v20, 0.0 }
 0x13f   : > { %v1521_v17 = vmax.f32 %v1457_v15, 0.0  ;;  %v1034_v18 = vpop.f32.mrf.mxu2 }
 0x140   : > { %v1203_v19 = vpop.f32.mrf.mxu3 }
 0x141   : > { %v2285_v21 = vpack.c.bf16 %v1521_v17, %v1520_v16  ;;  %v1204_v22 = vadd.f32 %v1203_v19, %v1034_v18  ;;  %v957_v23 = vpop.f32.mrf.mxu0 }
 0x142   : > { %v1126_v24 = vpop.f32.mrf.mxu1 }
 0x143   : > { %2409 = vst [vmem:[%s2809_s6 + $0x40] sm:$0xff] %v2285_v21   ;;  %v1489_v25 = vadd.f32 %v2793_v63, %v1204_v22  ;;  %v1127_v29 = vadd.f32 %v1126_v24, %v957_v23 }
 0x145   : > { %v1553_v27 = vmax.f32 %v1489_v25, 0.0  ;;  %v1458_v34 = vadd.f32 %v2793_v63, %v1127_v29 }
 0x147   : > { %v2365_v28 = vpack.c.bf16 %v1553_v27, %v1552_v26  ;;  %v1037_v30 = vpop.f32.mrf.mxu2  ;;  %v1522_v38 = vmax.f32 %v1458_v34, 0.0 }
 0x148   : > { %v1206_v31 = vpop.f32.mrf.mxu3 }
 0x149   : > { %2425 = vst [vmem:[%s2809_s6 + $0xc0] sm:$0xff] %v2365_v28   ;;  %v959_v32 = vpop.f32.mrf.mxu0  ;;  %v1207_v36 = vadd.f32 %v1206_v31, %v1037_v30 }
 0x14a   : > { %v1128_v33 = vpop.f32.mrf.mxu1 }
 0x14b   : > { %v1129_v35 = vadd.f32 %v1128_v33, %v959_v32  ;;  %v1490_v42 = vadd.f32 %v2793_v63, %v1207_v36 }
 0x14d   : > { %v1459_v37 = vadd.f32 %v2793_v63, %v1129_v35  ;;  %v1554_v48 = vmax.f32 %v1490_v42, 0.0 }
 0x14f   : > { %v1523_v39 = vmax.f32 %v1459_v37, 0.0  ;;  %v1039_v40 = vpop.f32.mrf.mxu2 }
 0x150   : > { %v1208_v41 = vpop.f32.mrf.mxu3 }
 0x151   : > { %v2290_v43 = vpack.c.bf16 %v1523_v39, %v1522_v38  ;;  %v1209_v44 = vadd.f32 %v1208_v41, %v1039_v40  ;;  %v962_v45 = vpop.f32.mrf.mxu0 }
 0x152   : > { %v1131_v46 = vpop.f32.mrf.mxu1 }
 0x153   : > { %2410 = vst [vmem:[%s2809_s6 + $0x48] sm:$0xff] %v2290_v43   ;;  %v1491_v47 = vadd.f32 %v2793_v63, %v1209_v44  ;;  %v1132_v51 = vadd.f32 %v1131_v46, %v962_v45 }
 0x155   : > { %v1555_v49 = vmax.f32 %v1491_v47, 0.0  ;;  %v1460_v56 = vadd.f32 %v2793_v63, %v1132_v51 }
 0x157   : > { %v2370_v50 = vpack.c.bf16 %v1555_v49, %v1554_v48  ;;  %v1042_v52 = vpop.f32.mrf.mxu2  ;;  %v1524_v60 = vmax.f32 %v1460_v56, 0.0 }
 0x158   : > { %v1211_v53 = vpop.f32.mrf.mxu3 }
 0x159   : > { %2426 = vst [vmem:[%s2809_s6 + $0xc8] sm:$0xff] %v2370_v50   ;;  %v964_v54 = vpop.f32.mrf.mxu0  ;;  %v1212_v58 = vadd.f32 %v1211_v53, %v1042_v52 }
 0x15a   : > { %v1133_v55 = vpop.f32.mrf.mxu1 }
 0x15b   : > { %v1134_v57 = vadd.f32 %v1133_v55, %v964_v54  ;;  %v1492_v1 = vadd.f32 %v2793_v63, %v1212_v58 }
 0x15d   : > { %v1461_v59 = vadd.f32 %v2793_v63, %v1134_v57  ;;  %v1556_v7 = vmax.f32 %v1492_v1, 0.0 }
 0x15f   : > { %v1525_v61 = vmax.f32 %v1461_v59, 0.0  ;;  %v1044_v62 = vpop.f32.mrf.mxu2 }
 0x160   : > { %v1213_v0 = vpop.f32.mrf.mxu3 }
 0x161   : > { %v2295_v2 = vpack.c.bf16 %v1525_v61, %v1524_v60  ;;  %v1214_v3 = vadd.f32 %v1213_v0, %v1044_v62  ;;  %v967_v4 = vpop.f32.mrf.mxu0 }
 0x162   : > { %v1136_v5 = vpop.f32.mrf.mxu1 }
 0x163   : > { %2411 = vst [vmem:[%s2809_s6 + $0x50] sm:$0xff] %v2295_v2   ;;  %v1493_v6 = vadd.f32 %v2793_v63, %v1214_v3  ;;  %v1137_v10 = vadd.f32 %v1136_v5, %v967_v4 }
 0x165   : > { %v1557_v8 = vmax.f32 %v1493_v6, 0.0  ;;  %v1462_v15 = vadd.f32 %v2793_v63, %v1137_v10 }
 0x167   : > { %v2375_v9 = vpack.c.bf16 %v1557_v8, %v1556_v7  ;;  %v1047_v11 = vpop.f32.mrf.mxu2  ;;  %v1526_v19 = vmax.f32 %v1462_v15, 0.0 }
 0x168   : > { %v1216_v12 = vpop.f32.mrf.mxu3 }
 0x169   : > { %2427 = vst [vmem:[%s2809_s6 + $0xd0] sm:$0xff] %v2375_v9   ;;  %v969_v13 = vpop.f32.mrf.mxu0  ;;  %v1217_v17 = vadd.f32 %v1216_v12, %v1047_v11 }
 0x16a   : > { %v1138_v14 = vpop.f32.mrf.mxu1 }
 0x16b   : > { %v1139_v16 = vadd.f32 %v1138_v14, %v969_v13  ;;  %v1494_v23 = vadd.f32 %v2793_v63, %v1217_v17 }
 0x16d   : > { %v1463_v18 = vadd.f32 %v2793_v63, %v1139_v16  ;;  %v1558_v29 = vmax.f32 %v1494_v23, 0.0 }
 0x16f   : > { %v1527_v20 = vmax.f32 %v1463_v18, 0.0  ;;  %v1049_v21 = vpop.f32.mrf.mxu2 }
 0x170   : > { %v1218_v22 = vpop.f32.mrf.mxu3 }
 0x171   : > { %v2300_v24 = vpack.c.bf16 %v1527_v20, %v1526_v19  ;;  %v1219_v25 = vadd.f32 %v1218_v22, %v1049_v21  ;;  %v972_v26 = vpop.f32.mrf.mxu0 }
 0x172   : > { %v1141_v27 = vpop.f32.mrf.mxu1 }
 0x173   : > { %2412 = vst [vmem:[%s2809_s6 + $0x58] sm:$0xff] %v2300_v24   ;;  %v1495_v28 = vadd.f32 %v2793_v63, %v1219_v25  ;;  %v1142_v32 = vadd.f32 %v1141_v27, %v972_v26 }
 0x175   : > { %v1559_v30 = vmax.f32 %v1495_v28, 0.0  ;;  %v1464_v37 = vadd.f32 %v2793_v63, %v1142_v32 }
 0x177   : > { %v2380_v31 = vpack.c.bf16 %v1559_v30, %v1558_v29  ;;  %v1052_v33 = vpop.f32.mrf.mxu2  ;;  %v1528_v41 = vmax.f32 %v1464_v37, 0.0 }
 0x178   : > { %v1221_v34 = vpop.f32.mrf.mxu3 }
 0x179   : > { %2428 = vst [vmem:[%s2809_s6 + $0xd8] sm:$0xff] %v2380_v31   ;;  %v974_v35 = vpop.f32.mrf.mxu0  ;;  %v1222_v39 = vadd.f32 %v1221_v34, %v1052_v33 }
 0x17a   : > { %v1143_v36 = vpop.f32.mrf.mxu1 }
 0x17b   : > { %v1144_v38 = vadd.f32 %v1143_v36, %v974_v35  ;;  %v1496_v45 = vadd.f32 %v2793_v63, %v1222_v39 }
 0x17d   : > { %v1465_v40 = vadd.f32 %v2793_v63, %v1144_v38  ;;  %v1560_v51 = vmax.f32 %v1496_v45, 0.0 }
 0x17f   : > { %v1529_v42 = vmax.f32 %v1465_v40, 0.0  ;;  %v1054_v43 = vpop.f32.mrf.mxu2 }
 0x180   : > { %v1223_v44 = vpop.f32.mrf.mxu3 }
 0x181   : > { %v2305_v46 = vpack.c.bf16 %v1529_v42, %v1528_v41  ;;  %v1224_v47 = vadd.f32 %v1223_v44, %v1054_v43  ;;  %v977_v48 = vpop.f32.mrf.mxu0 }
 0x182   : > { %v1146_v49 = vpop.f32.mrf.mxu1 }
 0x183   : > { %2413 = vst [vmem:[%s2809_s6 + $0x60] sm:$0xff] %v2305_v46   ;;  %v1497_v50 = vadd.f32 %v2793_v63, %v1224_v47  ;;  %v1147_v54 = vadd.f32 %v1146_v49, %v977_v48 }
 0x185   : > { %v1561_v52 = vmax.f32 %v1497_v50, 0.0  ;;  %v1466_v59 = vadd.f32 %v2793_v63, %v1147_v54 }
 0x187   : > { %v2385_v53 = vpack.c.bf16 %v1561_v52, %v1560_v51  ;;  %v1057_v55 = vpop.f32.mrf.mxu2  ;;  %v1530_v0 = vmax.f32 %v1466_v59, 0.0 }
 0x188   : > { %v1226_v56 = vpop.f32.mrf.mxu3 }
 0x189   : > { %2429 = vst [vmem:[%s2809_s6 + $0xe0] sm:$0xff] %v2385_v53   ;;  %v979_v57 = vpop.f32.mrf.mxu0  ;;  %v1227_v61 = vadd.f32 %v1226_v56, %v1057_v55 }
 0x18a   : > { %v1148_v58 = vpop.f32.mrf.mxu1 }
 0x18b   : > { %v1149_v60 = vadd.f32 %v1148_v58, %v979_v57  ;;  %v1498_v4 = vadd.f32 %v2793_v63, %v1227_v61 }
 0x18d   : > { %v1467_v62 = vadd.f32 %v2793_v63, %v1149_v60  ;;  %v1562_v10 = vmax.f32 %v1498_v4, 0.0 }
 0x18f   : > { %v1531_v1 = vmax.f32 %v1467_v62, 0.0  ;;  %v1059_v2 = vpop.f32.mrf.mxu2 }
 0x190   : > { %v1228_v3 = vpop.f32.mrf.mxu3 }
 0x191   : > { %v2310_v5 = vpack.c.bf16 %v1531_v1, %v1530_v0  ;;  %v1229_v6 = vadd.f32 %v1228_v3, %v1059_v2  ;;  %v982_v7 = vpop.f32.mrf.mxu0 }
 0x192   : > { %v1151_v8 = vpop.f32.mrf.mxu1 }
 0x193   : > { %2414 = vst [vmem:[%s2809_s6 + $0x68] sm:$0xff] %v2310_v5   ;;  %v1499_v9 = vadd.f32 %v2793_v63, %v1229_v6  ;;  %v1152_v13 = vadd.f32 %v1151_v8, %v982_v7 }
 0x195   : > { %v1563_v11 = vmax.f32 %v1499_v9, 0.0  ;;  %v1468_v18 = vadd.f32 %v2793_v63, %v1152_v13 }
 0x197   : > { %v2390_v12 = vpack.c.bf16 %v1563_v11, %v1562_v10  ;;  %v1062_v14 = vpop.f32.mrf.mxu2  ;;  %v1532_v22 = vmax.f32 %v1468_v18, 0.0 }
 0x198   : > { %v1231_v15 = vpop.f32.mrf.mxu3 }
 0x199   : > { %2430 = vst [vmem:[%s2809_s6 + $0xe8] sm:$0xff] %v2390_v12   ;;  %v984_v16 = vpop.f32.mrf.mxu0  ;;  %v1232_v20 = vadd.f32 %v1231_v15, %v1062_v14 }
 0x19a   : > { %v1153_v17 = vpop.f32.mrf.mxu1 }
 0x19b   : > { %v1154_v19 = vadd.f32 %v1153_v17, %v984_v16  ;;  %v1500_v26 = vadd.f32 %v2793_v63, %v1232_v20 }
 0x19d   : > { %v1469_v21 = vadd.f32 %v2793_v63, %v1154_v19  ;;  %v1564_v32 = vmax.f32 %v1500_v26, 0.0 }
 0x19f   : > { %v1533_v23 = vmax.f32 %v1469_v21, 0.0  ;;  %v1064_v24 = vpop.f32.mrf.mxu2 }
 0x1a0   : > { %v1233_v25 = vpop.f32.mrf.mxu3 }
 0x1a1   : > { %v2315_v27 = vpack.c.bf16 %v1533_v23, %v1532_v22  ;;  %v1234_v28 = vadd.f32 %v1233_v25, %v1064_v24  ;;  %v987_v29 = vpop.f32.mrf.mxu0 }
 0x1a2   : > { %v1156_v30 = vpop.f32.mrf.mxu1 }
 0x1a3   : > { %2415 = vst [vmem:[%s2809_s6 + $0x70] sm:$0xff] %v2315_v27   ;;  %v1501_v31 = vadd.f32 %v2793_v63, %v1234_v28  ;;  %v1157_v35 = vadd.f32 %v1156_v30, %v987_v29 }
 0x1a5   : > { %v1565_v33 = vmax.f32 %v1501_v31, 0.0  ;;  %v1470_v40 = vadd.f32 %v2793_v63, %v1157_v35 }
 0x1a7   : > { %v2395_v34 = vpack.c.bf16 %v1565_v33, %v1564_v32  ;;  %v1067_v36 = vpop.f32.mrf.mxu2  ;;  %v1534_v44 = vmax.f32 %v1470_v40, 0.0 }
 0x1a8   : > { %v1236_v37 = vpop.f32.mrf.mxu3 }
 0x1a9   : > { %2431 = vst [vmem:[%s2809_s6 + $0xf0] sm:$0xff] %v2395_v34   ;;  %v989_v38 = vpop.f32.mrf.mxu0  ;;  %v1237_v42 = vadd.f32 %v1236_v37, %v1067_v36 }
 0x1aa   : > { %v1158_v39 = vpop.f32.mrf.mxu1 }
 0x1ab   : > { %v1159_v41 = vadd.f32 %v1158_v39, %v989_v38  ;;  %v1502_v48 = vadd.f32 %v2793_v63, %v1237_v42 }
 0x1ad   : > { %v1471_v43 = vadd.f32 %v2793_v63, %v1159_v41  ;;  %v1566_v52 = vmax.f32 %v1502_v48, 0.0 }
 0x1af   : > { %v1535_v45 = vmax.f32 %v1471_v43, 0.0  ;;  %v1069_v46 = vpop.f32.mrf.mxu2 }
 0x1b0   : > { %v1238_v47 = vpop.f32.mrf.mxu3 }
 0x1b1   : > { %v2320_v49 = vpack.c.bf16 %v1535_v45, %v1534_v44  ;;  %v1239_v50 = vadd.f32 %v1238_v47, %v1069_v46 }
 0x1b3   : > { %2416 = vst [vmem:[%s2809_s6 + $0x78] sm:$0xff] %v2320_v49   ;;  %v1503_v51 = vadd.f32 %v2793_v63, %v1239_v50 }
 0x1b5   : > { %v1567_v53 = vmax.f32 %v1503_v51, 0.0 }
 0x1b7   : > { %v2400_v54 = vpack.c.bf16 %v1567_v53, %v1566_v52 }
 0x1b9   : > { %2432 = vst [vmem:[%s2809_s6 + $0xf8] sm:$0xff] %v2400_v54  }
 0x1ba   : > { %2534 = shalt.err (!%p2531_p5)
}
 0x1bb   : > { %s2587_s30 = smov 64   ;;  %s2588_s4 = smov 4  }
 0x1bc   : > { %2449 = dma.vmem_to_hbm [thread:$0]  (%p2649_p4), %s1711_s18, 4096, %s1713_s15, %s1697_s19, %s2587_s30, %s2587_s30, %s2588_s4  }
 0x1bd PF: > { %p2455_p6 = scmp.ge.s32.totalorder %s2585_s17, 2  ;;  %s1727_s5 = sand.u32 1, %s2565_s12  }
 0x1be   : > { %s1728_s6 = scalar_lea.sflag [#allocation4], %s1727_s5 }
 0x1bf   : > { %p2452_p7 = pnand %p2455_p6, %p2656_p8 }
 0x1c1   : > { %p2453_p9 = pneg %p2452_p7 }
 0x1c3   : > { %2560 = dma.done.wait (%p2453_p9), %s1728_s6, 4096  }
 0x1c4   : > { %2562 = vsyncadd (%p2453_p9), %s1728_s6, 4294963200  ;;  %s16_s17 = sadd.s32 1, %s2585_s17   ;;  %s2997_s12 = smov %s2569_s13 }
 0x1c5   : > { %p13_p10 = scmp.ge.s32.totalorder %s16_s17, 6   ;;  %s2998_s13 = smov %s2573_s14 }
 0x1c6   : > { %s2999_s14 = smov %s2662_s25  ;;  %s3000_s15 = smov %s2581_s16 }
 0x1c7   : > { %s3001_s16 = smov %s3003_s20  ;;  %15 = sbr.rel (!%p13_p10) target bundleno = 4 (0x4), region = 81 }
 0x1cc   :  { %1734 = vsyncpa [#allocation4], 1 }
 0x1cd   :  { %1736 = vsyncpa [#allocation4 + $0x1], 1 }

</bundles_post_ra>
